<compile_context>
chip_gen: v5e
topology: v5e:2x2
jax: 0.10.0
libtpu: 0.0.40
codegen_flags: <defaults>
</compile_context>

<pallas_src>
import numpy as np
import jax
import jax.numpy as jnp
from jax.experimental import pallas as pl
from jax.experimental.pallas import tpu as pltpu

_LANE = 128
_ROW_TILES = (256, 128, 64, 32, 16)


# --------------------------------------------------------------------------- helpers
def _round_up(n, m):
    return ((n + m - 1) // m) * m


def _choose_row_tile(row_counts, max_tile=256):
    """Largest row tile (from _ROW_TILES) whose total padded-row waste stays modest."""
    total = max(sum(row_counts), 1)
    for t in _ROW_TILES:
        if t > max_tile:
            continue
        waste = sum(_round_up(n, t) - n for n in row_counts)
        if waste <= max(64, total // 4):
            return t
    return 16


def _largest_divisor_tile(n, max_tile=256):
    for t in _ROW_TILES:
        if t <= max_tile and n % t == 0:
            return t
    return 16  # n is always a multiple of 16 here


def _vmem_ceiling_bytes():
    cap = 64 << 20  # conservative fallback = v7x per-core VMEM
    try:
        info = pltpu.get_tpu_info()
        cap = int(getattr(info, "vmem_capacity_bytes", cap))
    except Exception:
        pass
    return (cap * 3) // 4  # leave headroom for compiler-internal scratch


def _vmem_limit_bytes(block_bytes, ceiling):
    want = int(block_bytes) + (4 << 20)
    return int(min(max(want, 32 << 20), ceiling))


def _pad2d(x, rows, cols):
    r, c = x.shape
    return jnp.pad(x, ((0, rows - r), (0, cols - c)))


# --------------------------------------------------------------------------- kernels
def adapter_head_kernel(hid_ref, x_ref, w1_ref, b1_ref, w2_ref, b2_ref, z_ref):
    """Two-layer MLP + L2-normalize for one row tile of one head.

    hid_ref : SMEM (n_tiles,) i32 scalar-prefetch head ids (consumed by index_maps only)
    x_ref   : VMEM (TM, Dinp) bf16 row tile (pipelined)
    w1/w2   : VMEM bf16 weights of the selected head (resident between head switches)
    b1/b2   : VMEM (1, D) f32 biases of the selected head
    z_ref   : VMEM (TM, Doutp) bf16 normalized output rows
    """
    del hid_ref
    # layer 1: bf16 MXU matmul, f32 accumulation; bias + ReLU in f32 (VPU)
    h = jnp.dot(x_ref[...], w1_ref[...], preferred_element_type=jnp.float32)
    h = jnp.maximum(h + b1_ref[...], 0.0)
    # layer 2
    z = jnp.dot(h.astype(jnp.bfloat16), w2_ref[...],
                preferred_element_type=jnp.float32)
    z = z + b2_ref[...]
    # L2 normalization via EUP rsqrt (eps on the squared norm avoids NaN on zero rows)
    inv = jax.lax.rsqrt(jnp.sum(z * z, axis=1, keepdims=True) + 1e-12)
    z_ref[...] = (z * inv).astype(z_ref.dtype)


def logits_kernel(scale_ref, zi_ref, zt_ref, out_ref):
    """(TM, Dout) x (TN, Dout) -> (TM, TN) * exp(logit_scale); f32 accumulation."""
    acc = jax.lax.dot_general(
        zi_ref[...], zt_ref[...],
        dimension_numbers=(((1,), (1,)), ((), ())),
        preferred_element_type=jnp.float32)
    out_ref[...] = (acc * scale_ref[0, 0]).astype(out_ref.dtype)


# --------------------------------------------------------------------------- stage 1
def _fused_heads(x_all, head_id, w1s, b1s, w2s, b2s, *, tile_rows, vmem_ceiling):
    """Both adapter heads in one pallas_call; per-tile head selection via scalar prefetch."""
    rows, d_in_p = x_all.shape
    d_out_p = w2s.shape[2]
    n_tiles = rows // tile_rows

    # VMEM estimate: double-buffered resident weights/biases + streamed tiles + f32 temps.
    w_block = (d_in_p * d_in_p + d_in_p * d_out_p) * 2           # bf16, one head
    b_block = (d_in_p + d_out_p) * 4
    block_bytes = (
        2 * w_block + 2 * b_block
        + 2 * tile_rows * d_in_p * 2                             # x tile (bf16)
        + 2 * tile_rows * d_out_p * 2                            # z tile (bf16)
        + tile_rows * d_in_p * 4 + tile_rows * d_out_p * 4       # f32 intermediates h, z
    )

    grid_spec = pltpu.PrefetchScalarGridSpec(
        num_scalar_prefetch=1,
        grid=(n_tiles,),
        in_specs=[
            pl.BlockSpec((tile_rows, d_in_p), lambda i, hid: (i, 0)),          # x rows
            pl.BlockSpec((None, d_in_p, d_in_p), lambda i, hid: (hid[i], 0, 0)),   # w1
            pl.BlockSpec((None, 1, d_in_p), lambda i, hid: (hid[i], 0, 0)),        # b1
            pl.BlockSpec((None, d_in_p, d_out_p), lambda i, hid: (hid[i], 0, 0)),  # w2
            pl.BlockSpec((None, 1, d_out_p), lambda i, hid: (hid[i], 0, 0)),       # b2
        ],
        out_specs=pl.BlockSpec((tile_rows, d_out_p), lambda i, hid: (i, 0)),
    )
    return pl.pallas_call(
        adapter_head_kernel,
        out_shape=jax.ShapeDtypeStruct((rows, d_out_p), jnp.bfloat16),
        grid_spec=grid_spec,
        compiler_params=pltpu.CompilerParams(
            dimension_semantics=("parallel",),
            vmem_limit_bytes=_vmem_limit_bytes(block_bytes, vmem_ceiling)),
    )(head_id, x_all, w1s, b1s, w2s, b2s)


# --------------------------------------------------------------------------- stage 2
def _logits(scale11, z_img, z_txt, *, vmem_ceiling, out_dtype=jnp.float32):
    b_rows, d_out_p = z_img.shape
    c_rows, _ = z_txt.shape
    out_size = np.dtype(out_dtype).itemsize
    tile_b = _largest_divisor_tile(b_rows)

    resident_bytes = (
        2 * tile_b * d_out_p * 2          # z_img tile (bf16, double-buffered)
        + 2 * c_rows * d_out_p * 2        # z_txt resident slab (bf16)
        + 2 * tile_b * c_rows * out_size  # output block
        + tile_b * c_rows * 4             # f32 accumulator
    )

    if resident_bytes + (4 << 20) <= vmem_ceiling:
        # z_txt fully VMEM-resident, 1-D grid: no re-streaming of the text slab and
        # lane-dense (tile_b, c_rows) output stores.
        return pl.pallas_call(
            logits_kernel,
            out_shape=jax.ShapeDtypeStruct((b_rows, c_rows), out_dtype),
            grid=(b_rows // tile_b,),
            in_specs=[
                pl.BlockSpec(memory_space=pltpu.MemorySpace.SMEM),      # exp(logit_scale)
                pl.BlockSpec((tile_b, d_out_p), lambda i: (i, 0)),
                pl.BlockSpec((c_rows, d_out_p), lambda i: (0, 0)),      # resident
            ],
            out_specs=pl.BlockSpec((tile_b, c_rows), lambda i: (i, 0)),
            compiler_params=pltpu.CompilerParams(
                dimension_semantics=("parallel",),
                vmem_limit_bytes=_vmem_limit_bytes(resident_bytes, vmem_ceiling)),
        )(scale11, z_img, z_txt)

    # Fallback: 2-D tiled grid streaming z_txt column tiles (very large C * Dout only).
    tile_c = _largest_divisor_tile(c_rows)
    block_bytes = (2 * tile_b * d_out_p * 2 + 2 * tile_c * d_out_p * 2
                   + 2 * tile_b * tile_c * out_size + tile_b * tile_c * 4)
    return pl.pallas_call(
        logits_kernel,
        out_shape=jax.ShapeDtypeStruct((b_rows, c_rows), out_dtype),
        grid=(b_rows // tile_b, c_rows // tile_c),
        in_specs=[
            pl.BlockSpec(memory_space=pltpu.MemorySpace.SMEM),
            pl.BlockSpec((tile_b, d_out_p), lambda i, j: (i, 0)),
            pl.BlockSpec((tile_c, d_out_p), lambda i, j: (j, 0)),
        ],
        out_specs=pl.BlockSpec((tile_b, tile_c), lambda i, j: (i, j)),
        compiler_params=pltpu.CompilerParams(
            dimension_semantics=("parallel", "parallel"),
            vmem_limit_bytes=_vmem_limit_bytes(block_bytes, vmem_ceiling)),
    )(scale11, z_img, z_txt)


# --------------------------------------------------------------------------- params
def init_params(key, in_dim, out_dim):
    """Weights stored pre-transposed: kernels compute x @ w + b (== torch x @ W.T + b)."""
    ks = jax.random.split(key, 8)
    s = 1.0 / jnp.sqrt(in_dim)
    return {
        "wi1": jax.random.uniform(ks[0], (in_dim, in_dim), jnp.float32, -s, s),
        "bi1": jax.random.uniform(ks[1], (1, in_dim), jnp.float32, -s, s),
        "wi2": jax.random.uniform(ks[2], (in_dim, out_dim), jnp.float32, -s, s),
        "bi2": jax.random.uniform(ks[3], (1, out_dim), jnp.float32, -s, s),
        "wt1": jax.random.uniform(ks[4], (in_dim, in_dim), jnp.float32, -s, s),
        "bt1": jax.random.uniform(ks[5], (1, in_dim), jnp.float32, -s, s),
        "wt2": jax.random.uniform(ks[6], (in_dim, out_dim), jnp.float32, -s, s),
        "bt2": jax.random.uniform(ks[7], (1, out_dim), jnp.float32, -s, s),
    }


def prepare_params(params):
    """One-time pad/cast/stack of the adapter weights ([0]=image head, [1]=text head)."""
    f32, bf16 = jnp.float32, jnp.bfloat16
    d_in, d_out = params["wi2"].shape
    d_in_p, d_out_p = _round_up(d_in, _LANE), _round_up(d_out, _LANE)

    def wpad(a, r, c):
        return _pad2d(jnp.asarray(a, f32), r, c).astype(bf16)

    def bpad(a, c):
        return _pad2d(jnp.asarray(a, f32).reshape(1, -1), 1, c)

    return {
        "w1": jnp.stack([wpad(params["wi1"], d_in_p, d_in_p),
                         wpad(params["wt1"], d_in_p, d_in_p)]),
        "b1": jnp.stack([bpad(params["bi1"], d_in_p), bpad(params["bt1"], d_in_p)]),
        "w2": jnp.stack([wpad(params["wi2"], d_in_p, d_out_p),
                         wpad(params["wt2"], d_in_p, d_out_p)]),
        "b2": jnp.stack([bpad(params["bi2"], d_out_p), bpad(params["bt2"], d_out_p)]),
    }


# --------------------------------------------------------------------------- forward
def dual_adapter_forward(images, text_embeddings, prepared, logit_scale,
                         *, max_row_tile=256, logits_dtype=jnp.float32):
    """images: (B, Din) f32, text_embeddings: (C, Din). Returns (B, C) logits."""
    bf16 = jnp.bfloat16
    B, _ = images.shape
    C, _ = text_embeddings.shape
    d_in_p = prepared["w1"].shape[1]
    vmem_ceiling = _vmem_ceiling_bytes()

    # Common row tile for the fused head call; each branch pads to at most one tile.
    tile_rows = _choose_row_tile((B, C), max_row_tile)
    b_rows = _round_up(B, tile_rows)
    c_rows = _round_up(C, tile_rows)

    # Cast to bf16 *before* padding (half the wrapper-side pad traffic); zero padding
    # contributes exactly 0 to every dot product and norm.
    img_p = _pad2d(images.astype(bf16), b_rows, d_in_p)
    txt_p = _pad2d(text_embeddings.astype(bf16), c_rows, d_in_p)
    x_all = jnp.concatenate([img_p, txt_p], axis=0)

    nb, nc = b_rows // tile_rows, c_rows // tile_rows
    head_id = jnp.concatenate(
        [jnp.zeros((nb,), jnp.int32), jnp.ones((nc,), jnp.int32)])

    z_all = _fused_heads(x_all, head_id, prepared["w1"], prepared["b1"],
                         prepared["w2"], prepared["b2"],
                         tile_rows=tile_rows, vmem_ceiling=vmem_ceiling)
    z_img, z_txt = z_all[:b_rows], z_all[b_rows:]

    # exp(logit_scale) computed once here; applied to the f32 logits inside the kernel.
    scale11 = jnp.exp(jnp.asarray(logit_scale, jnp.float32)).reshape(1, 1)

    logits_p = _logits(scale11, z_img, z_txt, vmem_ceiling=vmem_ceiling,
                       out_dtype=logits_dtype)
    return logits_p[:B, :C]


# --------------------------------------------------------------------------- references
def reference_forward_f32(images, text_embeddings, params, logit_scale):
    """Pure-f32 JAX reference mirroring the PyTorch forward."""
    def head(x, w1, b1, w2, b2):
        h = jnp.maximum(x @ w1 + b1, 0.0)
        return h @ w2 + b2
    zi = head(images, params["wi1"], params["bi1"], params["wi2"], params["bi2"])
    zi = zi / jnp.linalg.norm(zi, axis=1, keepdims=True)
    zt = head(text_embeddings, params["wt1"], params["bt1"], params["wt2"], params["bt2"])
    zt = zt / jnp.linalg.norm(zt, axis=1, keepdims=True)
    return (zi @ zt.T) * jnp.exp(jnp.asarray(logit_scale, jnp.float32))


def reference_forward_matched(images, text_embeddings, params, logit_scale):
    """Reference using the same bf16-operand / f32-accumulate math as the kernels."""
    def head(x, w1, b1, w2, b2):
        h = jnp.dot(x.astype(jnp.bfloat16), w1.astype(jnp.bfloat16),
                    preferred_element_type=jnp.float32)
        h = jnp.maximum(h + b1, 0.0)
        z = jnp.dot(h.astype(jnp.bfloat16), w2.astype(jnp.bfloat16),
                    preferred_element_type=jnp.float32)
        z = z + b2
        inv = jax.lax.rsqrt(jnp.sum(z * z, axis=1, keepdims=True) + 1e-12)
        return (z * inv).astype(jnp.bfloat16)

    zi = head(images, params["wi1"], params["bi1"], params["wi2"], params["bi2"])
    zt = head(text_embeddings, params["wt1"], params["bt1"], params["wt2"], params["bt2"])
    dots = jax.lax.dot_general(zi, zt, (((1,), (1,)), ((), ())),
                               preferred_element_type=jnp.float32)
    return dots * jnp.exp(jnp.asarray(logit_scale, jnp.float32))


# --------------------------------------------------------------------------- demo
if __name__ == "__main__":
    key = jax.random.PRNGKey(0)
    k_img, k_txt, k_par = jax.random.split(key, 3)

    B, C = 8, 16              # image batch, number of text classes
    in_dim, out_dim = 32, 32
    initial_logit_scale = 2.0  # torch: nn.Parameter(torch.ones([]) * initial_logit_scale)

    images = jax.random.normal(k_img, (B, in_dim), jnp.float32)
    text_embeddings = jax.random.normal(k_txt, (C, in_dim), jnp.float32)
    params = init_params(k_par, in_dim, out_dim)

    prepared = prepare_params(params)          # pad/cast/stack once, outside the hot path
    fwd = jax.jit(dual_adapter_forward)
    logits = jax.block_until_ready(
        fwd(images, text_embeddings, prepared, jnp.float32(initial_logit_scale)))
    assert logits.shape == (B, C)

    # tight check vs a reference using identical (bf16-operand, f32-accumulate) precision
    ref_matched = reference_forward_matched(images, text_embeddings, params,
                                            initial_logit_scale)
    assert jnp.allclose(logits, ref_matched, atol=2e-3, rtol=1e-3), \
        "mismatch vs precision-matched reference"

    # loose sanity check vs the pure-f32 PyTorch-style reference (bf16 tolerance)
    ref_f32 = reference_forward_f32(images, text_embeddings, params,
                                    initial_logit_scale)
    assert jnp.allclose(logits, ref_f32, atol=3e-1, rtol=1e-1), \
        "mismatch vs f32 reference beyond bf16 tolerance"

    print("KERNEL_OK")
</pallas_src>

<mosaic_0001>
module attributes {stable_mosaic.version = 11 : i64} {
  func.func @adapter_head_kernel(%arg0: i32, %arg1: memref<2xi32, #tpu.memory_space<smem>>, %arg2: memref<32x128xbf16, #tpu.memory_space<vmem>>, %arg3: memref<1x128x128xbf16, #tpu.memory_space<vmem>>, %arg4: memref<1x1x128xf32, #tpu.memory_space<vmem>>, %arg5: memref<1x128x128xbf16, #tpu.memory_space<vmem>>, %arg6: memref<1x1x128xf32, #tpu.memory_space<vmem>>, %arg7: memref<32x128xbf16, #tpu.memory_space<vmem>>) attributes {dimension_semantics = [#tpu.dimension_semantics<parallel>], iteration_bounds = array<i64: 2>, scalar_prefetch = 1 : i64, scratch_operands = 0 : i64, tpu.core_type = #tpu.core_type<tc>, window_params = [{transform_indices = @transform_0, window_bounds = array<i64: 32, 128>}, {transform_indices = @transform_1, window_bounds = array<i64: 1, 128, 128>}, {transform_indices = @transform_2, window_bounds = array<i64: 1, 1, 128>}, {transform_indices = @transform_3, window_bounds = array<i64: 1, 128, 128>}, {transform_indices = @transform_4, window_bounds = array<i64: 1, 1, 128>}, {transform_indices = @transform_5, window_bounds = array<i64: 32, 128>}]} {
    %c0 = arith.constant 0 : index
    %c0_0 = arith.constant 0 : index
    %0 = vector.load %arg2[%c0, %c0_0] : memref<32x128xbf16, #tpu.memory_space<vmem>>, vector<32x128xbf16>
    %c0_1 = arith.constant 0 : index
    %c0_2 = arith.constant 0 : index
    %c0_3 = arith.constant 0 : index
    %1 = vector.load %arg3[%c0_1, %c0_2, %c0_3] : memref<1x128x128xbf16, #tpu.memory_space<vmem>>, vector<1x128x128xbf16>
    %2 = vector.shape_cast %1 : vector<1x128x128xbf16> to vector<128x128xbf16>
    %cst = arith.constant dense<0.000000e+00> : vector<32x128xf32>
    %3 = tpu.matmul %0, %2, %cst {dimension_numbers = #tpu.dot_dimension_numbers<[1], [0], [0], [1], [0, 0, 1, 1], [], []>} : vector<32x128xbf16>, vector<128x128xbf16>, vector<32x128xf32> -> vector<32x128xf32>
    %c0_4 = arith.constant 0 : index
    %c0_5 = arith.constant 0 : index
    %c0_6 = arith.constant 0 : index
    %4 = vector.load %arg4[%c0_4, %c0_5, %c0_6] : memref<1x1x128xf32, #tpu.memory_space<vmem>>, vector<1x1x128xf32>
    %5 = vector.shape_cast %4 : vector<1x1x128xf32> to vector<1x128xf32>
    %6 = vector.broadcast %5 : vector<1x128xf32> to vector<32x128xf32>
    %7 = arith.addf %3, %6 : vector<32x128xf32>
    %cst_7 = arith.constant 0.000000e+00 : f32
    %8 = vector.broadcast %cst_7 : f32 to vector<32x128xf32>
    %9 = arith.maximumf %7, %8 : vector<32x128xf32>
    %10 = arith.truncf %9 : vector<32x128xf32> to vector<32x128xbf16>
    %c0_8 = arith.constant 0 : index
    %c0_9 = arith.constant 0 : index
    %c0_10 = arith.constant 0 : index
    %11 = vector.load %arg5[%c0_8, %c0_9, %c0_10] : memref<1x128x128xbf16, #tpu.memory_space<vmem>>, vector<1x128x128xbf16>
    %12 = vector.shape_cast %11 : vector<1x128x128xbf16> to vector<128x128xbf16>
    %cst_11 = arith.constant dense<0.000000e+00> : vector<32x128xf32>
    %13 = tpu.matmul %10, %12, %cst_11 {dimension_numbers = #tpu.dot_dimension_numbers<[1], [0], [0], [1], [0, 0, 1, 1], [], []>} : vector<32x128xbf16>, vector<128x128xbf16>, vector<32x128xf32> -> vector<32x128xf32>
    %c0_12 = arith.constant 0 : index
    %c0_13 = arith.constant 0 : index
    %c0_14 = arith.constant 0 : index
    %14 = vector.load %arg6[%c0_12, %c0_13, %c0_14] : memref<1x1x128xf32, #tpu.memory_space<vmem>>, vector<1x1x128xf32>
    %15 = vector.shape_cast %14 : vector<1x1x128xf32> to vector<1x128xf32>
    %16 = vector.broadcast %15 : vector<1x128xf32> to vector<32x128xf32>
    %17 = arith.addf %13, %16 : vector<32x128xf32>
    %18 = arith.mulf %17, %17 : vector<32x128xf32>
    %cst_15 = arith.constant dense<0.000000e+00> : vector<32xf32>
    %19 = vector.multi_reduction <add>, %18, %cst_15 [1] : vector<32x128xf32> to vector<32xf32>
    %20 = vector.shape_cast %19 : vector<32xf32> to vector<32x1xf32>
    %cst_16 = arith.constant 9.99999996E-13 : f32
    %21 = vector.broadcast %cst_16 : f32 to vector<32x1xf32>
    %22 = arith.addf %20, %21 : vector<32x1xf32>
    %23 = math.rsqrt %22 : vector<32x1xf32>
    %24 = vector.broadcast %23 : vector<32x1xf32> to vector<32x128xf32>
    %25 = arith.mulf %17, %24 : vector<32x128xf32>
    %26 = arith.truncf %25 : vector<32x128xf32> to vector<32x128xbf16>
    %c0_17 = arith.constant 0 : index
    %c0_18 = arith.constant 0 : index
    %27 = vector.load %arg7[%c0_17, %c0_18] : memref<32x128xbf16, #tpu.memory_space<vmem>>, vector<32x128xbf16>
    tpu.vector_store %arg7[%c0_17, %c0_18], %26 {strides = array<i32>} : memref<32x128xbf16, #tpu.memory_space<vmem>>, vector<32x128xbf16>,
    return
  }
  func.func @transform_0(%arg0: i32, %arg1: memref<2xi32, #tpu.memory_space<smem>>) -> (i32, i32) {
    %c0_i32 = arith.constant 0 : i32
    %c0_i32_0 = arith.constant 0 : i32
    return %arg0, %c0_i32 : i32, i32
  }
  func.func @transform_1(%arg0: i32, %arg1: memref<2xi32, #tpu.memory_space<smem>>) -> (i32, i32, i32) {
    %0 = arith.index_cast %arg0 : i32 to index
    %1 = memref.load %arg1[%0] : memref<2xi32, #tpu.memory_space<smem>>
    %c0_i32 = arith.constant 0 : i32
    %c0_i32_0 = arith.constant 0 : i32
    %c0_i32_1 = arith.constant 0 : i32
    return %1, %c0_i32, %c0_i32_0 : i32, i32, i32
  }
  func.func @transform_2(%arg0: i32, %arg1: memref<2xi32, #tpu.memory_space<smem>>) -> (i32, i32, i32) {
    %0 = arith.index_cast %arg0 : i32 to index
    %1 = memref.load %arg1[%0] : memref<2xi32, #tpu.memory_space<smem>>
    %c0_i32 = arith.constant 0 : i32
    %c0_i32_0 = arith.constant 0 : i32
    %c0_i32_1 = arith.constant 0 : i32
    return %1, %c0_i32, %c0_i32_0 : i32, i32, i32
  }
  func.func @transform_3(%arg0: i32, %arg1: memref<2xi32, #tpu.memory_space<smem>>) -> (i32, i32, i32) {
    %0 = arith.index_cast %arg0 : i32 to index
    %1 = memref.load %arg1[%0] : memref<2xi32, #tpu.memory_space<smem>>
    %c0_i32 = arith.constant 0 : i32
    %c0_i32_0 = arith.constant 0 : i32
    %c0_i32_1 = arith.constant 0 : i32
    return %1, %c0_i32, %c0_i32_0 : i32, i32, i32
  }
  func.func @transform_4(%arg0: i32, %arg1: memref<2xi32, #tpu.memory_space<smem>>) -> (i32, i32, i32) {
    %0 = arith.index_cast %arg0 : i32 to index
    %1 = memref.load %arg1[%0] : memref<2xi32, #tpu.memory_space<smem>>
    %c0_i32 = arith.constant 0 : i32
    %c0_i32_0 = arith.constant 0 : i32
    %c0_i32_1 = arith.constant 0 : i32
    return %1, %c0_i32, %c0_i32_0 : i32, i32, i32
  }
  func.func @transform_5(%arg0: i32, %arg1: memref<2xi32, #tpu.memory_space<smem>>) -> (i32, i32) {
    %c0_i32 = arith.constant 0 : i32
    %c0_i32_0 = arith.constant 0 : i32
    return %arg0, %c0_i32 : i32, i32
  }
}

module attributes {stable_mosaic.version = 11 : i64} {
  func.func @logits_kernel(%arg0: i32, %arg1: memref<1x1xf32, #tpu.memory_space<smem>>, %arg2: memref<32x128xbf16, #tpu.memory_space<vmem>>, %arg3: memref<32x128xbf16, #tpu.memory_space<vmem>>, %arg4: memref<32x32xf32, #tpu.memory_space<vmem>>) attributes {dimension_semantics = [#tpu.dimension_semantics<parallel>], iteration_bounds = array<i64: 1>, scalar_prefetch = 0 : i64, scratch_operands = 0 : i64, tpu.core_type = #tpu.core_type<tc>, window_params = [{transform_indices = @transform_0, window_bounds = array<i64: 1, 1>}, {transform_indices = @transform_1, window_bounds = array<i64: 32, 128>}, {pipeline_mode = #tpu.pipeline_mode<synchronous>, transform_indices = @transform_2, window_bounds = array<i64: 32, 128>}, {transform_indices = @transform_3, window_bounds = array<i64: 32, 32>}]} {
    %c0 = arith.constant 0 : index
    %c0_0 = arith.constant 0 : index
    %0 = vector.load %arg2[%c0, %c0_0] : memref<32x128xbf16, #tpu.memory_space<vmem>>, vector<32x128xbf16>
    %c0_1 = arith.constant 0 : index
    %c0_2 = arith.constant 0 : index
    %1 = vector.load %arg3[%c0_1, %c0_2] : memref<32x128xbf16, #tpu.memory_space<vmem>>, vector<32x128xbf16>
    %cst = arith.constant dense<0.000000e+00> : vector<32x32xf32>
    %2 = tpu.matmul %0, %1, %cst {dimension_numbers = #tpu.dot_dimension_numbers<[1], [1], [0], [0], [0, 0, 1, 0], [], []>} : vector<32x128xbf16>, vector<32x128xbf16>, vector<32x32xf32> -> vector<32x32xf32>
    %c0_3 = arith.constant 0 : index
    %c0_4 = arith.constant 0 : index
    %3 = memref.load %arg1[%c0_3, %c0_4] : memref<1x1xf32, #tpu.memory_space<smem>>
    %4 = vector.broadcast %3 : f32 to vector<32x32xf32>
    %5 = arith.mulf %2, %4 : vector<32x32xf32>
    %c0_5 = arith.constant 0 : index
    %c0_6 = arith.constant 0 : index
    %6 = vector.load %arg4[%c0_5, %c0_6] : memref<32x32xf32, #tpu.memory_space<vmem>>, vector<32x32xf32>
    tpu.vector_store %arg4[%c0_5, %c0_6], %5 {strides = array<i32>} : memref<32x32xf32, #tpu.memory_space<vmem>>, vector<32x32xf32>,
    return
  }
  func.func @transform_0(%arg0: i32) -> (i32, i32) {
    %c0_i32 = arith.constant 0 : i32
    %c0_i32_0 = arith.constant 0 : i32
    %c0_i32_1 = arith.constant 0 : i32
    return %c0_i32, %c0_i32_0 : i32, i32
  }
  func.func @transform_1(%arg0: i32) -> (i32, i32) {
    %c0_i32 = arith.constant 0 : i32
    %c0_i32_0 = arith.constant 0 : i32
    return %arg0, %c0_i32 : i32, i32
  }
  func.func @transform_2(%arg0: i32) -> (i32, i32) {
    %c0_i32 = arith.constant 0 : i32
    %c0_i32_0 = arith.constant 0 : i32
    %c0_i32_1 = arith.constant 0 : i32
    return %c0_i32, %c0_i32_0 : i32, i32
  }
  func.func @transform_3(%arg0: i32) -> (i32, i32) {
    %c0_i32 = arith.constant 0 : i32
    %c0_i32_0 = arith.constant 0 : i32
    return %arg0, %c0_i32 : i32, i32
  }
}

</mosaic_0001>

<bundles_post_ra>
// kernel: dual_adapter_forward.3
= control target key start
LH: loop header
LB: loop body
LE: loop exit
PB: predicated region body
PF: predicated region fallthrough
CT: control target
= control target key end

     0   :  { %vm73_vm0 = vcmask 261120   ;;  %s151_s2 = inlined_call_operand.vmem [shape: bf16[32,128], index: 2, kind: input, shape index: {}]   ;;  %s152_s1 = inlined_call_operand.vmem [shape: bf16[32,128], index: 1, kind: input, shape index: {}]   ;;  %s153_s0 = inlined_call_operand.<no memory space> [shape: f32[1,1], index: 0, kind: input, shape index: {}]   ;;  %s154_s3 = inlined_call_operand.vmem [shape: f32[32,32], index: 3, kind: output, shape index: {}]  }
   0x1   :  { %v101_v0 = vld [vmem:[%s151_s2 + $0x8] sm:$0xff]  ;;  %v100_v1 = vld [vmem:[%s151_s2] sm:$0xff]  ;;  %v68_v4 = vstv %s153_s0 }
   0x2   :  { %54 = vmatpush.bf16.xpose.msra.mxu0 %v101_v0  ;;  %102 = vmatpush.bf16.xpose.msra.mxu1 %v101_v0  ;;  %v98_v2 = vld [vmem:[%s152_s1] sm:$0xff]  ;;  %v99_v3 = vld [vmem:[%s152_s1 + $0x8] sm:$0xff] }
   0xa   :  { %55 = vmatpush.bf16.xpose.msra.mxu0 %v100_v1  ;;  %103 = vmatpush.bf16.xpose.msra.mxu1 %v100_v1 }
  0x11   :  { %56 = vmatmul.bf16.vlgmr.msra.gmra.mxu0 %v98_v2  ;;  %61 = vmatmul.bf16.vlgmr.msra.gmra.mxu1 %v99_v3 }
  0x8e   :  { %v57_v5 = vpop.f32.mrf.mxu0  ;;  %v62_v6 = vpop.f32.mrf.mxu1 }
  0x8f   :  { %v69_v7 = vmul.f32 %v68_v4, %v57_v5  ;;  %v71_v8 = vmul.f32 %v68_v4, %v62_v6 }
  0x91   :  { %74 = vst.msk [vmem:[%s154_s3] sm:$0xff] %vm73_vm0, %v69_v7 }
  0x92   :  { %76 = vst.msk [vmem:[%s154_s3 + $0x10] sm:$0xff] %vm73_vm0, %v71_v8 }
  0x96   :  { %v59_v9 = vpop.f32.mrf.mxu0  ;;  %v64_v10 = vpop.f32.mrf.mxu1 }
  0x97   :  { %v70_v11 = vmul.f32 %v68_v4, %v59_v9  ;;  %v72_v12 = vmul.f32 %v68_v4, %v64_v10 }
  0x99   :  { %75 = vst.msk [vmem:[%s154_s3 + $0x8] sm:$0xff] %vm73_vm0, %v70_v11 }
  0x9a   :  { %77 = vst.msk [vmem:[%s154_s3 + $0x18] sm:$0xff] %vm73_vm0, %v72_v12 }

// kernel: dual_adapter_forward.2
= control target key start
LH: loop header
LB: loop body
LE: loop exit
PB: predicated region body
PF: predicated region fallthrough
CT: control target
= control target key end

     0   :  { %s1120_s24 = smov [#allocation3]   ;;  %s1407_s0 = inlined_call_operand.vmem [shape: s32[2], index: 0, kind: input, shape index: {}]   ;;  %s1408_s1 = inlined_call_operand.vmem [shape: bf16[64,128], index: 1, kind: input, shape index: {}]   ;;  %s1409_s2 = inlined_call_operand.hbm [shape: bf16[2,128,128], index: 2, kind: input, shape index: {}]   ;;  %s1410_s3 = inlined_call_operand.vmem [shape: f32[2,1,128], index: 3, kind: input, shape index: {}]   ;;  %s1411_s4 = inlined_call_operand.hbm [shape: bf16[2,128,128], index: 4, kind: input, shape index: {}]   ;;  %s1412_s5 = inlined_call_operand.vmem [shape: f32[2,1,128], index: 5, kind: input, shape index: {}]   ;;  %s1413_s6 = inlined_call_operand.vmem [shape: bf16[64,128], index: 6, kind: output, shape index: {}]  }
   0x1   :  { %1418 = sst [smem:[#allocation18_spill]] %s1409_s2  ;;  %s12_s23 = sshll.u32 %s1407_s0, 4  ;;  %s13_s23 = int_to_ptr.vmem [resolvable:$true] %s12_s23 }
   0x2   :  { %15 = dma.vmem_to_smem %s13_s23, 16, %s1120_s24, [#allocation2] }
   0x3   :  { %1082 = dma.done.wait [#allocation2], 16 }
   0x4   :  { %1083 = vsyncadd [#allocation2], 4294967280 }
   0x5   :  { %18 = sfence }
   0x6   :  { %19 = vsyncpa [#allocation5], 0 }
   0x7   :  { %21 = vsyncpa [#allocation5 + $0x1], 0 }
   0x8   :  { %22 = vsyncpa [#allocation7], 0 }
   0x9   :  { %24 = vsyncpa [#allocation7 + $0x1], 0  ;;  %s1161_s25 = smov 0   ;;  %s1163_s26 = smov 0  }
   0xa   :  { %s1165_s27 = smov 0   ;;  %s1167_s28 = smov 0  }
   0xb   :  { %s1169_s29 = smov 0   ;;  %s1171_s0 = smov 0  }
   0xc   :  { %s1173_s30 = smov 0  }
   0xd LB: > { %1419 = sst [smem:[#allocation15_spill]] %s1114_s0  ;;  %s1195_s7 = sadd.s32 4294967295, %s1118_s30   ;;  %s1118_s30 = sphi %s1173_s30, %s1441_s30   ;;  %s1114_s0 = sphi %s1171_s0, %s1440_s0   ;;  %s1110_s29 = sphi %s1169_s29, %s1439_s29   ;;  %s1106_s28 = sphi %s1167_s28, %s1438_s28   ;;  %s1102_s27 = sphi %s1165_s27, %s1437_s27   ;;  %s1098_s26 = sphi %s1163_s26, %s1436_s26   ;;  %s1094_s25 = sphi %s1161_s25, %s1435_s25  }
   0xe   : > { %s1198_s8 = sadd.s32 1, %s1118_s30   ;;  %s60_s9 = sld [smem:[#allocation3 + %s1118_s30]] }
   0xf   : > { %s65_s10 = sadd.s32 1, %s1114_s0  ;;  %s61_s11 = sld [smem:[#allocation3 + %s1198_s8]] }
  0x10   : > { %p72_p0 = scmp.ne.s32.totalorder %s1114_s0, %s1110_s29  ;;  %p73_p1 = scmp.eq.s32.totalorder %s1118_s30, 0 }
  0x11   : > { %p78_p2 = scmp.ne.s32.totalorder %s1110_s29, %s1106_s28  ;;  %p79_p3 = scmp.eq.s32.totalorder %s1195_s7, 0 }
  0x12   : > { %p1210_p4 = por %p73_p1, %p72_p0  ;;  %p912_p5 = scmp.lt.s32.totalorder %s1118_s30, 2 }
  0x13   : > { %p1217_p6 = por %p79_p3, %p78_p2  ;;  %s221_s14 = sand.u32 1, %s1114_s0  }
  0x14   : > { %s759_s15 = sshll.u32 %s221_s14, 6  ;;  %p1241_p8 = pnand %p912_p5, %p1210_p4 }
  0x15   : > { %s62_s16 = ssub.s32 %s60_s9, %s61_s11  ;;  %s225_s17 = scalar_lea.vmem [#allocation4], %s759_s15 }
  0x16   : > { %p63_p7 = scmp.eq.s32.totalorder %s62_s16, 0  ;;  %s1222_s18 = sshll.u32 %s225_s17, 4 }
  0x17   : > { %1422 = sst [smem:[#allocation16_spill]] %s1222_s18  ;;  %p765_p9 = scmp.ge.s32.totalorder %s1118_s30, 1 }
  0x18   : > { %s893_s19 = scalar_select %p1210_p4, [#allocation3], [#allocation8] }
  0x19   : > { %s1227_s20 = scalar_select %p63_p7, %s1114_s0, %s65_s10  }
  0x1a   : > { %s894_s21 = scalar_select %p1210_p4, %s1118_s30, 0 }
  0x1b   : > { %1423 = sst [smem:[#allocation17_spill]] %s1227_s20  ;;  %s1443_s19 = smov (!%p912_p5, %s893_s19), [#allocation10] }
  0x1c   : > { %s1445_s21 = smov (!%p912_p5, %s894_s21), 0  ;;  %p281_p10 = scmp.lt.s32.totalorder %s1118_s30, 3 }
  0x1d   : > { %s226_s23 = sld [smem:[%s1443_s19 + %s1445_s21]]  ;;  %s222_s17 = scalar_lea.sflag [#allocation5], %s221_s14 }
  0x1e   : > { %p1247_p11 = pnand %p765_p9, %p281_p10  ;;  %s1426_s2 = sld [smem:[#allocation18_spill]] }
  0x1f   : > { %s116_s15 = sld [smem:[#allocation3 + %s1118_s30]]  ;;  %p998_p13 = pneg %p1241_p8 }
  0x20   : > { %s117_s16 = sld [smem:[#allocation3 + %s1198_s8]] }
  0x23   : > { %s846_s28 = sshll.u32 %s226_s23, 6 }
  0x24   : > { %s231_s11 = scalar_lea.hbm %s1426_s2, %s846_s28  ;;  %s1001_s23 = scalar_lea.hbm %s1426_s2, 128 }
  0x25   : > { %s232_s12 = sshll.u32 %s231_s11, 4  ;;  %s233_s12 = int_to_ptr.hbm [resolvable:$true] %s232_s12 }
  0x26   : > { %s994_s18 = sshra.s32 %s233_s12, 4  ;;  %s995_s18 = int_to_ptr.hbm [resolvable:$true] %s994_s18 }
  0x27   : > { %s996_s20 = scalar_lea.hbm %s995_s18, 64  ;;  %p1002_p4 = scmp.lt.s32.totalorder %s995_s18, %s1426_s2 }
  0x28   : > { %p997_p12 = scmp.ne.s32.totalorder %s995_s18, %s996_s20  ;;  %p1003_p7 = scmp.lt.s32.totalorder %s1001_s23, %s996_s20 }
  0x2a   : > { %p999_p0 = pnand %p998_p13, %p997_p12  ;;  %p1004_p9 = por %p1003_p7, %p1002_p4 }
  0x2c   : > { %p1000_p2 = pneg %p999_p0 }
  0x2e   : > { %p1005_p10 = pnand %p1004_p9, %p1000_p2 }
  0x30   : > { %1008 = shalt.err (!%p1005_p10)
}
  0x31   : > { %s1416_s14 = smov 64   ;;  %s1427_s28 = sld [smem:[#allocation16_spill]] }
  0x32   : > { %s1417_s0 = smov 4   ;;  %p128_p12 = scmp.ne.s32.totalorder %s1102_s27, %s1098_s26 }
  0x33   : > { %p134_p13 = scmp.ne.s32.totalorder %s1098_s26, %s1094_s25  ;;  %s121_s20 = sadd.s32 1, %s1102_s27 }
  0x34   : > { %s252_s11 = sand.u32 1, %s1102_s27   ;;  %s118_s19 = ssub.s32 %s116_s15, %s117_s16 }
  0x35   : > { %p1278_p0 = por %p134_p13, %p79_p3  ;;  %p130_p2 = por %p128_p12, %p73_p1 }
  0x36   : > { %p119_p4 = scmp.eq.s32.totalorder %s118_s19, 0  ;;  %s762_s22 = sshll.u32 %s252_s11, 6 }
  0x37   : > { %s1428_s18 = int_to_ptr.vmem [resolvable:$true] %s1427_s28  ;;  %p1287_p7 = pnand %p912_p5, %p130_p2 }
  0x38   : > { %906 = dma.hbm_to_vmem [thread:$0]  (!%p1241_p8), %s233_s12, 1024, %s1428_s18, %s222_s17, %s1416_s14, %s1416_s14, %s1417_s0  }
  0x39   : > { %s1292_s12 = scalar_select %p119_p4, %s1102_s27, %s121_s20  }
  0x3a   : > { %s896_s25 = scalar_select %p130_p2, [#allocation3], [#allocation9] }
  0x3b   : > { %s897_s17 = scalar_select %p130_p2, %s1118_s30, 0 }
  0x3c   : > { %s1447_s25 = smov (!%p912_p5, %s896_s25), [#allocation11]  ;;  %s256_s15 = scalar_lea.vmem [#allocation6], %s762_s22 }
  0x3d   : > { %s1449_s17 = smov (!%p912_p5, %s897_s17), 0  ;;  %s265_s16 = sshll.u32 %s256_s15, 4  ;;  %s266_s16 = int_to_ptr.vmem [resolvable:$true] %s265_s16 }
  0x3e   : > { %s257_s23 = sld [smem:[%s1447_s25 + %s1449_s17]]  ;;  %s253_s20 = scalar_lea.sflag [#allocation7], %s252_s11 }
  0x3f   : > { %p1028_p3 = pneg %p1287_p7  ;;  %s1031_s25 = scalar_lea.hbm %s1411_s4, 128 }
  0x44   : > { %s847_s9 = sshll.u32 %s257_s23, 6 }
  0x45   : > { %s262_s19 = scalar_lea.hbm %s1411_s4, %s847_s9 }
  0x46   : > { %s263_s14 = sshll.u32 %s262_s19, 4  ;;  %s264_s14 = int_to_ptr.hbm [resolvable:$true] %s263_s14 }
  0x47   : > { %s1024_s0 = sshra.s32 %s264_s14, 4  ;;  %s1025_s0 = int_to_ptr.hbm [resolvable:$true] %s1024_s0 }
  0x48   : > { %s1026_s2 = scalar_lea.hbm %s1025_s0, 64  ;;  %p1032_p9 = scmp.lt.s32.totalorder %s1025_s0, %s1411_s4 }
  0x49   : > { %p1027_p1 = scmp.ne.s32.totalorder %s1025_s0, %s1026_s2  ;;  %p1033_p10 = scmp.lt.s32.totalorder %s1031_s25, %s1026_s2 }
  0x4b   : > { %p1029_p8 = pnand %p1028_p3, %p1027_p1  ;;  %p1034_p12 = por %p1033_p10, %p1032_p9 }
  0x4d   : > { %p1030_p5 = pneg %p1029_p8 }
  0x4f   : > { %p1035_p13 = pnand %p1034_p12, %p1030_p5 }
  0x51   : > { %1038 = shalt.err (!%p1035_p13)
}
  0x52   : > { %s1431_s11 = smov 4   ;;  %s1432_s15 = smov 64  }
  0x53   : > { %911 = dma.hbm_to_vmem [thread:$0]  (!%p1287_p7), %s264_s14, 1024, %s266_s16, %s253_s20, %s1432_s15, %s1432_s15, %s1431_s11  }
  0x54   : > { %285 = sbr.rel (%p1247_p11) target bundleno = 557 (0x22d), region = 40  ;;  %s287_s9 = sand.u32 (!%p1247_p11), 1, %s1110_s29  }
  0x55   : > { %s766_s28 = sshll.u32 (!%p1247_p11), %s287_s9, 6  ;;  %s288_s18 = scalar_lea.sflag (!%p1247_p11), [#allocation5], %s287_s9 }
  0x56   : > { %s1318_s19 = scalar_lea.vmem (!%p1247_p11), [#allocation4], %s766_s28 }
  0x59   : > { %1085 = dma.done.wait (%p1217_p6), %s288_s18, 1024  }
  0x5a   : > { %1087 = vsyncadd (%p1217_p6), %s288_s18, 4294966272  ;;  %s297_s2 = sand.u32 1, %s1098_s26  }
  0x5b   : > { %s767_s0 = sshll.u32 %s297_s2, 6  ;;  %s298_s14 = scalar_lea.sflag [#allocation7], %s297_s2 }
  0x5c   : > { %s1325_s21 = scalar_lea.vmem [#allocation6], %s767_s0 }
  0x5d   : > { %1089 = dma.done.wait (%p1278_p0), %s298_s14, 1024  }
  0x5e   : > { %1091 = vsyncadd (%p1278_p0), %s298_s14, 4294966272  ;;  %s354_s13 = sld [smem:[#allocation3 + %s1195_s7]]  ;;  %v857_v0 = vld [vmem:[%s1318_s19 + $0x38] sm:$0xff]  ;;  %v856_v1 = vld [vmem:[%s1318_s19 + $0x30] sm:$0xff]  ;;  %s768_s20 = sshll.u32 %s1195_s7, 2 }
  0x5f   : > { %455 = vmatpush.bf16.msra.mxu0 %v857_v0  ;;  %877 = vmatpush.bf16.msra.mxu2 %v857_v0  ;;  %v865_v2 = vld [vmem:[%s1325_s21 + $0x38] sm:$0xff]  ;;  %v864_v3 = vld [vmem:[%s1325_s21 + $0x30] sm:$0xff]  ;;  %v855_v4 = vld [vmem:[%s1318_s19 + $0x28] sm:$0xff]  ;;  %p348_p11 = scmp.lt.s32.totalorder %s768_s20, 7  ;;  %s360_s23 = sld [smem:[#allocation3 + %s1195_s7]] }
  0x60   : > { %548 = vmatpush.bf16.msra.mxu1 %v865_v2  ;;  %885 = vmatpush.bf16.msra.mxu3 %v865_v2  ;;  %v863_v5 = vld [vmem:[%s1325_s21 + $0x28] sm:$0xff]  ;;  %v854_v6 = vld [vmem:[%s1318_s19 + $0x20] sm:$0xff]  ;;  %v853_v8 = vld [vmem:[%s1318_s19 + $0x18] sm:$0xff] }
  0x61   : > { %v862_v7 = vld [vmem:[%s1325_s21 + $0x20] sm:$0xff]  ;;  %v852_v9 = vld [vmem:[%s1318_s19 + $0x10] sm:$0xff]  ;;  %s1453_s20 = smov (!%p348_p11, %s768_s20), 7  ;;  %v851_v10 = vld [vmem:[%s1318_s19 + $0x8] sm:$0xff] }
  0x62   : > { %s769_s30 = sshll.u32 %s1453_s20, 2  ;;  %v850_v11 = vld [vmem:[%s1318_s19] sm:$0xff]  ;;  %v861_v14 = vld [vmem:[%s1325_s21 + $0x18] sm:$0xff]  ;;  %v860_v15 = vld [vmem:[%s1325_s21 + $0x10] sm:$0xff] }
  0x63   : > { %456 = vmatpush.bf16.msra.mxu0 %v856_v1  ;;  %878 = vmatpush.bf16.msra.mxu2 %v856_v1  ;;  %s351_s17 = scalar_lea.vmem %s1408_s1, %s769_s30  ;;  %v859_v16 = vld [vmem:[%s1325_s21 + $0x8] sm:$0xff]  ;;  %v858_v17 = vld [vmem:[%s1325_s21] sm:$0xff]  ;;  %s369_s2 = scalar_lea.vmem %s1413_s6, %s769_s30 }
  0x64   : > { %p355_p6 = scmp.lt.s32.totalorder %s354_s13, 1  ;;  %549 = vmatpush.bf16.msra.mxu1 %v864_v3  ;;  %886 = vmatpush.bf16.msra.mxu3 %v864_v3  ;;  %v848_v12 = vld [vmem:[%s351_s17] sm:$0xff]  ;;  %v849_v13 = vld [vmem:[%s351_s17 + $0x8] sm:$0xff] }
  0x65   : > { %p361_p0 = scmp.lt.s32.totalorder %s360_s23, 1 }
  0x66   : > { %s1451_s13 = smov (!%p355_p6, %s354_s13), 1 }
  0x67   : > { %s357_s16 = scalar_lea.vmem %s1410_s3, %s1451_s13  ;;  %457 = vmatpush.bf16.msra.mxu0 %v855_v4  ;;  %879 = vmatpush.bf16.msra.mxu2 %v855_v4  ;;  %s1455_s23 = smov (!%p361_p0, %s360_s23), 1 }
  0x68   : > { %550 = vmatpush.bf16.msra.mxu1 %v863_v5  ;;  %887 = vmatpush.bf16.msra.mxu3 %v863_v5  ;;  %s363_s9 = scalar_lea.vmem %s1412_s5, %s1455_s23  ;;  %v972_v19 = vld [vmem:[%s357_s16] ss:$0 sm:$0xff] }
  0x69   : > { %v973_v33 = vld [vmem:[%s363_s9] ss:$0 sm:$0xff] }
  0x6b   : > { %458 = vmatpush.bf16.msra.mxu0 %v854_v6  ;;  %880 = vmatpush.bf16.msra.mxu2 %v854_v6 }
  0x6c   : > { %551 = vmatpush.bf16.msra.mxu1 %v862_v7  ;;  %888 = vmatpush.bf16.msra.mxu3 %v862_v7 }
  0x6f   : > { %459 = vmatpush.bf16.msra.mxu0 %v853_v8  ;;  %881 = vmatpush.bf16.msra.mxu2 %v853_v8 }
  0x70   : > { %552 = vmatpush.bf16.msra.mxu1 %v861_v14  ;;  %889 = vmatpush.bf16.msra.mxu3 %v861_v14 }
  0x73   : > { %460 = vmatpush.bf16.msra.mxu0 %v852_v9  ;;  %882 = vmatpush.bf16.msra.mxu2 %v852_v9 }
  0x74   : > { %553 = vmatpush.bf16.msra.mxu1 %v860_v15  ;;  %890 = vmatpush.bf16.msra.mxu3 %v860_v15 }
  0x77   : > { %461 = vmatpush.bf16.msra.mxu0 %v851_v10  ;;  %883 = vmatpush.bf16.msra.mxu2 %v851_v10 }
  0x78   : > { %554 = vmatpush.bf16.msra.mxu1 %v859_v16  ;;  %891 = vmatpush.bf16.msra.mxu3 %v859_v16 }
  0x7b   : > { %462 = vmatpush.bf16.msra.mxu0 %v850_v11  ;;  %884 = vmatpush.bf16.msra.mxu2 %v850_v11 }
  0x7c   : > { %555 = vmatpush.bf16.msra.mxu1 %v858_v17  ;;  %892 = vmatpush.bf16.msra.mxu3 %v858_v17 }
  0x7e   : > { %463 = vmatmul.bf16.vlgmr.msra.gmra.mxu0 %v848_v12  ;;  %468 = vmatmul.bf16.vlgmr.msra.gmra.mxu2 %v849_v13 }
  0xfb   : > { %v464_v18 = vpop.f32.mrf.mxu0 }
  0xfc   : > { %v465_v20 = vadd.f32 %v972_v19, %v464_v18 }
  0xfe   : > { %v474_v23 = vmax.f32 %v465_v20, 0.0 }
 0x101   : > { %v469_v21 = vpop.f32.mrf.mxu2 }
 0x102   : > { %v470_v26 = vadd.f32 %v972_v19, %v469_v21 }
 0x103   : > { %v466_v22 = vpop.f32.mrf.mxu0 }
 0x104   : > { %v467_v24 = vadd.f32 %v972_v19, %v466_v22  ;;  %v476_v30 = vmax.f32 %v470_v26, 0.0 }
 0x106   : > { %v475_v25 = vmax.f32 %v467_v24, 0.0 }
 0x108   : > { %v478_v27 = vpack.c.bf16 %v475_v25, %v474_v23 }
 0x109   : > { %v471_v28 = vpop.f32.mrf.mxu2 }
 0x10a   : > { %v472_v29 = vadd.f32 %v972_v19, %v471_v28  ;;  %556 = vmatmul.bf16.vlgmr.msra.gmra.mxu1 %v478_v27 }
 0x10c   : > { %v477_v31 = vmax.f32 %v472_v29, 0.0 }
 0x10e   : > { %v479_v32 = vpack.c.bf16 %v477_v31, %v476_v30 }
 0x110   : > { %561 = vmatmul.bf16.vlgmr.msra.gmra.mxu3 %v479_v32 }
 0x187   : > { %v557_v34 = vpop.f32.mrf.mxu1 }
 0x188   : > { %v558_v35 = vadd.f32 %v973_v33, %v557_v34 }
 0x18a   : > { %v567_v36 = vmul.f32 %v558_v35, %v558_v35 }
 0x18c   : > { %571 = vadd.xlane.f32.xlu0 %v567_v36 }
 0x18f   : > { %v559_v37 = vpop.f32.mrf.mxu1 }
 0x190   : > { %v560_v38 = vadd.f32 %v973_v33, %v559_v37 }
 0x192   : > { %v568_v39 = vmul.f32 %v560_v38, %v560_v38 }
 0x193   : > { %v562_v40 = vpop.f32.mrf.mxu3 }
 0x194   : > { %v1375_v41 = vadd.f32 %v973_v33, %v562_v40  ;;  %573 = vadd.xlane.f32.xlu0 %v568_v39 }
 0x196   : > { %v569_v42 = vmul.f32 %v1375_v41, %v1375_v41 }
 0x198   : > { %575 = vadd.xlane.f32.xlu1 %v569_v42 }
 0x19b   : > { %v564_v43 = vpop.f32.mrf.mxu3 }
 0x19c   : > { %v565_v44 = vadd.f32 %v973_v33, %v564_v43 }
 0x19e   : > { %v570_v45 = vmul.f32 %v565_v44, %v565_v44 }
 0x1a0   : > { %577 = vadd.xlane.f32.xlu1 %v570_v45 }
 0x1ff   : > { %v572_v46 = vpop.xlane.xlu0 %571 }
 0x200   : > { %v579_v47 = vadd.f32 1e-12, %v572_v46 }
 0x202   : > { %974 = vrsqrt.f32 %v579_v47  ;;  %vm589_vm1 = vweird.f32 %v579_v47 }
 0x207   : > { %v574_v48 = vpop.xlane.xlu0 %573 }
 0x208   : > { %v975_v49 = vpop.eup %974  ;;  %v580_v50 = vadd.f32 1e-12, %v574_v48 }
 0x209   : > { %v584_v51 = vmul.f32 %v975_v49, %v579_v47  ;;  %vm590_vm0 = vweird.f32 %v975_v49 }
 0x20a   : > { %976 = vrsqrt.f32 %v580_v50  ;;  %vm591_vm3 = vmor %vm589_vm1, %vm590_vm0  ;;  %vm599_vm4 = vweird.f32 %v580_v50 }
 0x20b   : > { %v585_v52 = vmul.f32 %v975_v49, %v584_v51  ;;  %v576_v53 = vpop.xlane.xlu1 %575 }
 0x20c   : > { %v581_v54 = vadd.f32 1e-12, %v576_v53 }
 0x20d   : > { %v586_v55 = vmul.f32 0.5, %v585_v52 }
 0x20e   : > { %978 = vrsqrt.f32 %v581_v54  ;;  %vm609_vm7 = vweird.f32 %v581_v54 }
 0x20f   : > { %v587_v57 = vsub.f32 1.5, %v586_v55 }
 0x210   : > { %v977_v56 = vpop.eup %976 }
 0x211   : > { %v594_v58 = vmul.f32 %v977_v56, %v580_v50  ;;  %v588_v63 = vmul.f32 %v975_v49, %v587_v57  ;;  %vm600_vm2 = vweird.f32 %v977_v56 }
 0x212   : > { %vm601_vm5 = vmor %vm599_vm4, %vm600_vm2 }
 0x213   : > { %v595_v59 = vmul.f32 %v977_v56, %v594_v58  ;;  %v578_v60 = vpop.xlane.xlu1 %577  ;;  %v592_v4 = vsel %vm591_vm3, %v975_v49, %v588_v63 }
 0x214   : > { %v979_v61 = vpop.eup %978  ;;  %v582_v62 = vadd.f32 1e-12, %v578_v60  ;;  %v623_v9 = vmul.f32 %v592_v4, %v558_v35 }
 0x215   : > { %v596_v0 = vmul.f32 0.5, %v595_v59  ;;  %v604_v1 = vmul.f32 %v979_v61, %v581_v54  ;;  %vm610_vm6 = vweird.f32 %v979_v61 }
 0x216   : > { %980 = vrsqrt.f32 %v582_v62  ;;  %vm611_vm9 = vmor %vm609_vm7, %vm610_vm6  ;;  %vm619_vm10 = vweird.f32 %v582_v62 }
 0x217   : > { %v597_v2 = vsub.f32 1.5, %v596_v0  ;;  %v605_v3 = vmul.f32 %v979_v61, %v604_v1 }
 0x219   : > { %v598_v5 = vmul.f32 %v977_v56, %v597_v2  ;;  %v606_v6 = vmul.f32 0.5, %v605_v3 }
 0x21b   : > { %v602_v7 = vsel %vm601_vm5, %v977_v56, %v598_v5  ;;  %v607_v11 = vsub.f32 1.5, %v606_v6 }
 0x21c   : > { %v981_v8 = vpop.eup %980  ;;  %v624_v10 = vmul.f32 %v602_v7, %v560_v38 }
 0x21d   : > { %v614_v12 = vmul.f32 %v981_v8, %v582_v62  ;;  %v608_v15 = vmul.f32 %v979_v61, %v607_v11  ;;  %vm620_vm8 = vweird.f32 %v981_v8 }
 0x21e   : > { %v869_v13 = vpack.c.bf16 %v624_v10, %v623_v9  ;;  %vm621_vm11 = vmor %vm619_vm10, %vm620_vm8 }
 0x21f   : > { %v615_v14 = vmul.f32 %v981_v8, %v614_v12  ;;  %v612_v18 = vsel %vm611_vm9, %v979_v61, %v608_v15 }
 0x220   : > { %870 = vst [vmem:[%s369_s2] sm:$0xff] %v869_v13   ;;  %v625_v21 = vmul.f32 %v612_v18, %v1375_v41 }
 0x221   : > { %v616_v16 = vmul.f32 0.5, %v615_v14 }
 0x223   : > { %v617_v17 = vsub.f32 1.5, %v616_v16 }
 0x225   : > { %v618_v19 = vmul.f32 %v981_v8, %v617_v17 }
 0x227   : > { %v622_v20 = vsel %vm621_vm11, %v981_v8, %v618_v19 }
 0x228   : > { %v626_v22 = vmul.f32 %v622_v20, %v565_v44 }
 0x22a   : > { %v874_v23 = vpack.c.bf16 %v626_v22, %v625_v21 }
 0x22c   : > { %876 = vst [vmem:[%s369_s2 + $0x8] sm:$0xff] %v874_v23  }
 0x22d PF: > { %s1433_s0 = sld [smem:[#allocation15_spill]]  ;;  %p27_p2 = scmp.ge.s32.totalorder %s1198_s8, 4  }
 0x22e   : > { %s1434_s14 = sld [smem:[#allocation17_spill]]  ;;  %s1435_s25 = smov %s1098_s26 }
 0x22f   : > { %s1436_s26 = smov %s1102_s27  ;;  %s1437_s27 = smov %s1292_s12 }
 0x230   : > { %s1438_s28 = smov %s1110_s29  ;;  %s1441_s30 = smov %s1198_s8 }
 0x231   :  { %29 = sbr.rel (!%p27_p2) target bundleno = 13 (0xd), region = 102 }
 0x233   : > { %s1439_s29 = smov %s1433_s0 }
 0x234   : > { %s1440_s0 = smov %s1434_s14 }
 0x236   :  { %657 = vsyncpa [#allocation5], 1 }
 0x237   :  { %659 = vsyncpa [#allocation5 + $0x1], 1 }
 0x238   :  { %660 = vsyncpa [#allocation7], 1 }
 0x239   :  { %662 = vsyncpa [#allocation7 + $0x1], 1 }

</bundles_post_ra>
